<compile_context>
chip_gen: v7x
topology: tpu7x:2x2x1
jax: 0.10.0
libtpu: 0.0.40
codegen_flags: <defaults>
</compile_context>

<pallas_src>
import functools

import jax
import jax.numpy as jnp
from jax.experimental import pallas as pl
from jax.experimental.pallas import tpu as pltpu


def _avgpool_kernel(x_ref, o_ref, xp_ref, *, ksize, stride, padding,
                    h, w, h_out, w_out):
    # x_ref : (TB, H, W)        unpadded input slabs
    # o_ref : (TB, H_out, W_out)
    # xp_ref: (TB, H+2p, W+2p)  f32 VMEM scratch = zero-padded image
    #
    # Fused padding: zero the scratch, then drop the block into its interior.
    # (Zeroing every step keeps this correct even when the parallel grid axis
    # is split across TensorCores, where program_id(0)==0 may never occur.)
    xp_ref[...] = jnp.zeros_like(xp_ref)
    xp_ref[:, padding:padding + h, padding:padding + w] = (
        x_ref[...].astype(jnp.float32))

    xp = xp_ref[...]                                        # (TB, Hp, Wp) f32
    tb = xp.shape[0]
    acc = jnp.zeros((tb, h_out, w_out), jnp.float32)
    for dh in range(ksize):                                 # static k*k taps
        for dw in range(ksize):
            acc = acc + xp[:, dh:dh + stride * h_out:stride,
                              dw:dw + stride * w_out:stride]
    # count_include_pad=True -> constant divisor ksize**2
    o_ref[...] = (acc * (1.0 / float(ksize * ksize))).astype(o_ref.dtype)


def _round_up(a, m):
    return (a + m - 1) // m * m


def _choose_block_slabs(nc, h, w, hp, wp, h_out, w_out, itemsize):
    """How many (N*C) slabs to process per grid step.

    Sized against a conservative ~20 MiB block-data budget (fits all TPU
    generations' scoped-VMEM limits, including v7x's 64 MiB physical), and
    capped so the parallel grid has >= 2 steps so both v7x TensorCores get
    work."""
    lane, sub = 128, 8
    per_in = _round_up(h, sub) * _round_up(w, lane) * itemsize
    per_out = _round_up(h_out, sub) * _round_up(w_out, lane) * itemsize
    per_scr = _round_up(hp, sub) * _round_up(wp, lane) * 4
    per_slab = 2 * per_in + 2 * per_out + per_scr   # double-buffered I/O + scratch
    budget = 20 * 1024 * 1024
    tb = max(1, budget // per_slab)
    tb = min(tb, 1024)
    if nc >= 2:
        tb = min(tb, -(-nc // 2))                   # ensure >= 2 grid steps
    return int(min(tb, nc))


def avgpool2d(x, *, kernel_size=3, padding=1, stride=1):
    """Matches torch.nn.AvgPool2d(kernel_size, padding=padding, stride=stride)
    with count_include_pad=True (the PyTorch default)."""
    n, c, h, w = x.shape
    h_out = (h + 2 * padding - kernel_size) // stride + 1
    w_out = (w + 2 * padding - kernel_size) // stride + 1
    hp, wp = h + 2 * padding, w + 2 * padding

    nc = n * c
    xr = x.reshape(nc, h, w)                        # free (no extra HBM pass)

    tb = _choose_block_slabs(nc, h, w, hp, wp, h_out, w_out, x.dtype.itemsize)
    grid = (pl.cdiv(nc, tb),)
    # If tb does not divide nc, the tail block's out-of-range slabs read
    # unspecified data, but slabs are independent and out-of-range output
    # rows are masked on writeback, so results stay correct.

    kern = functools.partial(_avgpool_kernel, ksize=kernel_size,
                             stride=stride, padding=padding,
                             h=h, w=w, h_out=h_out, w_out=w_out)

    out = pl.pallas_call(
        kern,
        out_shape=jax.ShapeDtypeStruct((nc, h_out, w_out), x.dtype),
        grid_spec=pltpu.PrefetchScalarGridSpec(
            num_scalar_prefetch=0,
            grid=grid,
            in_specs=[pl.BlockSpec((tb, h, w), lambda i: (i, 0, 0))],
            out_specs=pl.BlockSpec((tb, h_out, w_out), lambda i: (i, 0, 0)),
            scratch_shapes=[pltpu.VMEM((tb, hp, wp), jnp.float32)],
        ),
        compiler_params=pltpu.CompilerParams(
            dimension_semantics=("parallel",),
            vmem_limit_bytes=32 * 1024 * 1024),
    )(xr)

    return out.reshape(n, c, h_out, w_out)


def _reference_avgpool(x, kernel_size=3, padding=1, stride=1):
    # Pure-JAX reference (count_include_pad=True semantics).
    n, c, h, w = x.shape
    h_out = (h + 2 * padding - kernel_size) // stride + 1
    w_out = (w + 2 * padding - kernel_size) // stride + 1
    xp = jnp.pad(x, ((0, 0), (0, 0), (padding, padding), (padding, padding)))
    acc = jnp.zeros((n, c, h_out, w_out), jnp.float32)
    for dh in range(kernel_size):
        for dw in range(kernel_size):
            acc = acc + xp[:, :, dh:dh + stride * h_out:stride,
                           dw:dw + stride * w_out:stride].astype(jnp.float32)
    return (acc / (kernel_size * kernel_size)).astype(x.dtype)


if __name__ == "__main__":
    key = jax.random.PRNGKey(0)
    x = jax.random.normal(key, (2, 4, 16, 16), dtype=jnp.float32)

    y = avgpool2d(x, kernel_size=3, padding=1, stride=1)
    y = jax.block_until_ready(y)
    y_ref = _reference_avgpool(x, kernel_size=3, padding=1, stride=1)
    assert y.shape == (2, 4, 16, 16), y.shape
    assert jnp.allclose(y, y_ref, atol=1e-5, rtol=1e-5), "mismatch vs reference"

    # Also exercise the non-divisible (tail-masked) slab path.
    x2 = jax.random.normal(jax.random.PRNGKey(1), (1, 3, 16, 16),
                           dtype=jnp.float32)
    y2 = jax.block_until_ready(avgpool2d(x2))
    assert jnp.allclose(y2, _reference_avgpool(x2), atol=1e-5, rtol=1e-5), \
        "tail-block mismatch"

    print("KERNEL_OK")
</pallas_src>

<mosaic_0001>
module attributes {stable_mosaic.version = 11 : i64} {
  func.func @_avgpool_kernel(%arg0: i32, %arg1: memref<4x16x16xf32, #tpu.memory_space<vmem>>, %arg2: memref<4x16x16xf32, #tpu.memory_space<vmem>>, %arg3: memref<4x18x18xf32, #tpu.memory_space<vmem>>) attributes {dimension_semantics = [#tpu.dimension_semantics<parallel>], iteration_bounds = array<i64: 2>, scalar_prefetch = 0 : i64, scratch_operands = 1 : i64, tpu.core_type = #tpu.core_type<tc>, window_params = [{transform_indices = @transform_0, window_bounds = array<i64: 4, 16, 16>}, {transform_indices = @transform_1, window_bounds = array<i64: 4, 16, 16>}]} {
    %cst = arith.constant 0.000000e+00 : f32
    %0 = vector.broadcast %cst : f32 to vector<4x18x18xf32>
    %c0 = arith.constant 0 : index
    %c0_0 = arith.constant 0 : index
    %c0_1 = arith.constant 0 : index
    %1 = vector.load %arg3[%c0, %c0_0, %c0_1] : memref<4x18x18xf32, #tpu.memory_space<vmem>>, vector<4x18x18xf32>
    tpu.vector_store %arg3[%c0, %c0_0, %c0_1], %0 {strides = array<i32>} : memref<4x18x18xf32, #tpu.memory_space<vmem>>, vector<4x18x18xf32>,
    %c0_2 = arith.constant 0 : index
    %c0_3 = arith.constant 0 : index
    %c0_4 = arith.constant 0 : index
    %2 = vector.load %arg1[%c0_2, %c0_3, %c0_4] : memref<4x16x16xf32, #tpu.memory_space<vmem>>, vector<4x16x16xf32>
    %c0_5 = arith.constant 0 : index
    %c1 = arith.constant 1 : index
    %c1_6 = arith.constant 1 : index
    %3 = vector.load %arg3[%c0_5, %c1, %c1_6] : memref<4x18x18xf32, #tpu.memory_space<vmem>>, vector<4x16x16xf32>
    tpu.vector_store %arg3[%c0_5, %c1, %c1_6], %2 {strides = array<i32>} : memref<4x18x18xf32, #tpu.memory_space<vmem>>, vector<4x16x16xf32>,
    %c0_7 = arith.constant 0 : index
    %c0_8 = arith.constant 0 : index
    %c0_9 = arith.constant 0 : index
    %4 = vector.load %arg3[%c0_7, %c0_8, %c0_9] : memref<4x18x18xf32, #tpu.memory_space<vmem>>, vector<4x18x18xf32>
    %cst_10 = arith.constant 0.000000e+00 : f32
    %5 = vector.broadcast %cst_10 : f32 to vector<4x16x16xf32>
    %6 = vector.extract_strided_slice %4 {offsets = [0, 0, 0], sizes = [4, 16, 16], strides = [1, 1, 1]} : vector<4x18x18xf32> to vector<4x16x16xf32>
    %7 = arith.addf %5, %6 : vector<4x16x16xf32>
    %8 = vector.extract_strided_slice %4 {offsets = [0, 0, 1], sizes = [4, 16, 16], strides = [1, 1, 1]} : vector<4x18x18xf32> to vector<4x16x16xf32>
    %9 = arith.addf %7, %8 : vector<4x16x16xf32>
    %10 = vector.extract_strided_slice %4 {offsets = [0, 0, 2], sizes = [4, 16, 16], strides = [1, 1, 1]} : vector<4x18x18xf32> to vector<4x16x16xf32>
    %11 = arith.addf %9, %10 : vector<4x16x16xf32>
    %12 = vector.extract_strided_slice %4 {offsets = [0, 1, 0], sizes = [4, 16, 16], strides = [1, 1, 1]} : vector<4x18x18xf32> to vector<4x16x16xf32>
    %13 = arith.addf %11, %12 : vector<4x16x16xf32>
    %14 = vector.extract_strided_slice %4 {offsets = [0, 1, 1], sizes = [4, 16, 16], strides = [1, 1, 1]} : vector<4x18x18xf32> to vector<4x16x16xf32>
    %15 = arith.addf %13, %14 : vector<4x16x16xf32>
    %16 = vector.extract_strided_slice %4 {offsets = [0, 1, 2], sizes = [4, 16, 16], strides = [1, 1, 1]} : vector<4x18x18xf32> to vector<4x16x16xf32>
    %17 = arith.addf %15, %16 : vector<4x16x16xf32>
    %18 = vector.extract_strided_slice %4 {offsets = [0, 2, 0], sizes = [4, 16, 16], strides = [1, 1, 1]} : vector<4x18x18xf32> to vector<4x16x16xf32>
    %19 = arith.addf %17, %18 : vector<4x16x16xf32>
    %20 = vector.extract_strided_slice %4 {offsets = [0, 2, 1], sizes = [4, 16, 16], strides = [1, 1, 1]} : vector<4x18x18xf32> to vector<4x16x16xf32>
    %21 = arith.addf %19, %20 : vector<4x16x16xf32>
    %22 = vector.extract_strided_slice %4 {offsets = [0, 2, 2], sizes = [4, 16, 16], strides = [1, 1, 1]} : vector<4x18x18xf32> to vector<4x16x16xf32>
    %23 = arith.addf %21, %22 : vector<4x16x16xf32>
    %cst_11 = arith.constant 0.111111112 : f32
    %24 = vector.broadcast %cst_11 : f32 to vector<4x16x16xf32>
    %25 = arith.mulf %23, %24 : vector<4x16x16xf32>
    %c0_12 = arith.constant 0 : index
    %c0_13 = arith.constant 0 : index
    %c0_14 = arith.constant 0 : index
    %26 = vector.load %arg2[%c0_12, %c0_13, %c0_14] : memref<4x16x16xf32, #tpu.memory_space<vmem>>, vector<4x16x16xf32>
    tpu.vector_store %arg2[%c0_12, %c0_13, %c0_14], %25 {strides = array<i32>} : memref<4x16x16xf32, #tpu.memory_space<vmem>>, vector<4x16x16xf32>,
    return
  }
  func.func @transform_0(%arg0: i32) -> (i32, i32, i32) {
    %c0_i32 = arith.constant 0 : i32
    %c0_i32_0 = arith.constant 0 : i32
    %c0_i32_1 = arith.constant 0 : i32
    return %arg0, %c0_i32, %c0_i32_0 : i32, i32, i32
  }
  func.func @transform_1(%arg0: i32) -> (i32, i32, i32) {
    %c0_i32 = arith.constant 0 : i32
    %c0_i32_0 = arith.constant 0 : i32
    %c0_i32_1 = arith.constant 0 : i32
    return %arg0, %c0_i32, %c0_i32_0 : i32, i32, i32
  }
}

</mosaic_0001>

<bundles_post_ra>
// kernel: tpu_custom_call.1
= control target key start
LH: loop header
LB: loop body
LE: loop exit
PB: predicated region body
PF: predicated region fallthrough
CT: control target
= control target key end

     0   :  { %6 = vsyncpa [#allocation4], 0  ;;  %s1205_s0 = inlined_call_operand.hbm [shape: f32[8,16,16], index: 0, kind: input, shape index: {}]   ;;  %s1206_s1 = inlined_call_operand.hbm [shape: f32[8,16,16], index: 1, kind: output, shape index: {}]  }
   0x1   :  { %8 = vsyncpa [#allocation4 + $0x1], 0 }
   0x2   :  { %9 = vsyncpa [#allocation5], 0 }
   0x3   :  { %11 = vsyncpa [#allocation5 + $0x1], 0  ;;  %s796_s6 = smov 0   ;;  %s798_s7 = smov 0  }
   0x4   :  { %s800_s8 = smov 0   ;;  %s802_s9 = smov 0  }
   0x5 LB: > { %s817_s10 = sadd.s32 4294967295, %s774_s9   ;;  %s604_s11 = sadd.s32 4294967294, %s774_s9   ;;  %s774_s9 = sphi %s802_s9, %s1238_s9   ;;  %s770_s8 = sphi %s800_s8, %s1237_s8   ;;  %s766_s7 = sphi %s798_s7, %s1236_s7   ;;  %s762_s6 = sphi %s796_s6, %s1235_s6  }
   0x6   : > { %s821_s12 = sadd.s32 1, %s774_s9   ;;  %s24_s13 = sadd.s32 1, %s770_s8 }
   0x7   : > { %s21_s14 = ssub.s32 %s774_s9, %s821_s12  ;;  %p31_p0 = scmp.ne.s32.totalorder %s770_s8, %s766_s7 }
   0x8   : > { %p22_p1 = scmp.eq.s32.totalorder %s21_s14, 0  ;;  %p32_p2 = scmp.eq.s32.totalorder %s774_s9, 0 }
   0x9   : > { %p37_p3 = scmp.ne.s32.totalorder %s766_s7, %s762_s6  ;;  %p38_p4 = scmp.eq.s32.totalorder %s817_s10, 0 }
   0xa   : > { %s833_s15 = scalar_select %p22_p1, %s770_s8, %s24_s13  }
   0xb   : > { %p835_p5 = por %p32_p2, %p31_p0  ;;  %p839_p6 = por %p38_p4, %p37_p3 }
   0xc   : > { %p61_p7 = scmp.eq.s32.totalorder %s817_s10, 1  ;;  %p67_p8 = scmp.eq.s32.totalorder %s604_s11, 1 }
   0xd   : > { %p636_p10 = scmp.lt.s32.totalorder %s774_s9, 2  ;;  %s87_s20 = sand.u32 1, %s770_s8  }
   0xe   : > { %p846_p11 = por %p61_p7, %p31_p0  ;;  %p850_p12 = por %p67_p8, %p37_p3 }
   0xf   : > { %s621_s21 = sshll.u32 %s774_s9, 10  ;;  %s607_s22 = sshll.u32 %s87_s20, 6 }
  0x10   : > { %s1215_s18 = scalar_select %p846_p11, 1, 0 }
  0x11   : > { %s1216_s19 = scalar_select %p850_p12, 1, 0 }
  0x12   : > { %s859_s25 = scalar_lea.hbm %s1205_s0, %s621_s21  ;;  %s91_s26 = scalar_lea.vmem [#allocation3], %s607_s22 }
  0x13   : > { %s99_s27 = sshll.u32 %s91_s26, 4  ;;  %p863_p13 = pnand %p636_p10, %p835_p5  ;;  %s867_s27 = int_to_ptr.vmem [resolvable:$true] %s99_s27 }
  0x14   : > { %s869_s29 = scalar_lea.sflag [#allocation4], %s87_s20  ;;  %s678_s30 = scalar_lea.hbm %s859_s25, 1024 }
  0x15   : > { %p679_p0 = scmp.ne.s32.totalorder %s859_s25, %s678_s30  ;;  %p680_p1 = pneg %p863_p13 }
  0x16   : > { %s683_s4 = scalar_lea.hbm %s1205_s0, 2048  ;;  %p684_p4 = scmp.lt.u32.totalorder %s859_s25, %s1205_s0 }
  0x17   : > { %p681_p2 = pnand %p680_p1, %p679_p0  ;;  %p685_p5 = scmp.lt.u32.totalorder %s683_s4, %s678_s30 }
  0x18   : > { %p687_p8 = scmp.lt.u32.totalorder %s678_s30, %s859_s25 }
  0x19   : > { %p682_p3 = pneg %p681_p2  ;;  %p686_p7 = por %p685_p5, %p684_p4 }
  0x1b   : > { %p688_p10 = por %p687_p8, %p686_p7 }
  0x1d   : > { %p689_p9 = pnand %p688_p10, %p682_p3 }
  0x1f   : > { %692 = shalt.err (!%p689_p9)
}
  0x20   : > { %s693_s13 = scalar_lea.vmem %s867_s27, 1024  ;;  %s776_s14 = smov [#allocation3]  }
  0x21   : > { %p694_p0 = scmp.ne.s32.totalorder %s867_s27, %s693_s13  ;;  %s698_s16 = sshll.u32 %s776_s14, 4  ;;  %s699_s16 = int_to_ptr.vmem [resolvable:$false] %s698_s16 }
  0x22   : > { %s700_s20 = scalar_lea.vmem %s699_s16, 2048  ;;  %p701_p11 = scmp.lt.s32.totalorder %s867_s27, %s699_s16 }
  0x23   : > { %p696_p2 = pnand %p694_p0, %p680_p1  ;;  %p702_p4 = scmp.lt.s32.totalorder %s700_s20, %s693_s13 }
  0x25   : > { %p697_p12 = pneg %p696_p2  ;;  %p703_p5 = por %p702_p4, %p701_p11 }
  0x27   : > { %p704_p7 = pnand %p703_p5, %p697_p12 }
  0x29   : > { %707 = shalt.err (!%p704_p7)
}
  0x2a   : > { %s777_s21 = smov 128   ;;  %s778_s22 = smov 8  }
  0x2b   : > { %631 = dma.hbm_to_vmem [thread:$0]  (!%p863_p13), %s859_s25, 1024, %s867_s27, %s869_s29, %s777_s21, %s777_s21, %s778_s22  }
  0x2c   : > { %p611_p9 = scmp.ge.s32.totalorder %s774_s9, 1  ;;  %p107_p1 = scmp.lt.s32.totalorder %s774_s9, 3 }
  0x2e   : > { %p108_p3 = pnand %p611_p9, %p107_p1 }
  0x30   : > { %111 = sbr.rel (%p108_p3) target bundleno = 414 (0x19e), region = 24 }
  0x37   : > { %s900_s23 = sand.u32 1, %s766_s7  }
  0x38   : > { %s612_s24 = sshll.u32 %s900_s23, 6  ;;  %s114_s26 = scalar_lea.sflag [#allocation4], %s900_s23 }
  0x39   : > { %s906_s30 = scalar_lea.vmem [#allocation3], %s612_s24 }
  0x3a   : > { %753 = dma.done.wait (%p839_p6), %s114_s26, 1024  }
  0x3b   : > { %755 = vsyncadd (%p839_p6), %s114_s26, 4294966272  ;;  %vm138_vm0 = vcmask 146432   ;;  %vm141_vm1 = vcmask 140288   ;;  %v779_v0 = vmov 0.0   ;;  %v154_v1 = vld [vmem:[%s906_s30 + $0x10] sm:$0xff]  ;;  %v152_v2 = vld [vmem:[%s906_s30] sm:$0xff] }
  0x3c   : > { %143 = vst.msk [vmem:[#allocation2 + $0x18] sm:$0xff] %vm138_vm0, %v779_v0  ;;  %144 = vst.msk [vmem:[#allocation2 + $0x20] sm:$0xff] %vm138_vm0, %v779_v0  ;;  %s780_s17 = smov 1   ;;  %v155_v3 = vld [vmem:[%s906_s30 + $0x18] sm:$0xff]  ;;  %v153_v4 = vld [vmem:[%s906_s30 + $0x8] sm:$0xff]  ;;  %vm192_vm2 = vcmask 138248  }
  0x3d   : > { %139 = vst.msk [vmem:[#allocation2] sm:$0xff] %vm138_vm0, %v779_v0  ;;  %140 = vst.msk [vmem:[#allocation2 + $0x8] sm:$0xff] %vm138_vm0, %v779_v0  ;;  %172 = vrot.lane.b32.xlu1 %v154_v1, %s780_s17  ;;  %168 = vrot.lane.b32.xlu0 %v152_v2, %s780_s17  ;;  %v156_v5 = vld [vmem:[%s906_s30 + $0x20] sm:$0xff]  ;;  %v157_v6 = vld [vmem:[%s906_s30 + $0x28] sm:$0xff]  ;;  %s781_s25 = smov 127   ;;  %s782_s27 = smov 126  }
  0x3e   : > { %146 = vst.msk [vmem:[#allocation2 + $0x30] sm:$0xff] %vm138_vm0, %v779_v0  ;;  %147 = vst.msk [vmem:[#allocation2 + $0x38] sm:$0xff] %vm138_vm0, %v779_v0  ;;  %v158_v7 = vld [vmem:[%s906_s30 + $0x30] sm:$0xff]  ;;  %v159_v8 = vld [vmem:[%s906_s30 + $0x38] sm:$0xff]  ;;  %vm297_vm3 = vcmask 1046528   ;;  %vm398_vm4 = vcmask 1045504  }
  0x3f   : > { %149 = vst.msk [vmem:[#allocation2 + $0x48] sm:$0xff] %vm138_vm0, %v779_v0  ;;  %150 = vst.msk [vmem:[#allocation2 + $0x50] sm:$0xff] %vm138_vm0, %v779_v0  ;;  %vm507_vm5 = vcmask 130048   ;;  %s1131_s28 = scalar_lea.vmem [#allocation6], %s612_s24  ;;  %s623_s29 = sshll.u32 %s817_s10, 10 }
  0x40   : > { %145 = vst.msk [vmem:[#allocation2 + $0x28] sm:$0x3] %vm141_vm1, %v779_v0  ;;  %142 = vst.msk [vmem:[#allocation2 + $0x10] sm:$0x3] %vm141_vm1, %v779_v0  ;;  %s531_s2 = sshll.u32 %s1131_s28, 4  ;;  %s1157_s5 = scalar_lea.hbm %s1206_s1, %s623_s29  ;;  %s1159_s2 = int_to_ptr.vmem [resolvable:$true] %s531_s2 }
  0x41   : > { %148 = vst.msk [vmem:[#allocation2 + $0x40] sm:$0x3] %vm141_vm1, %v779_v0  ;;  %151 = vst.msk [vmem:[#allocation2 + $0x58] sm:$0x3] %vm141_vm1, %v779_v0  ;;  %174 = vrot.lane.b32.xlu1 %v155_v3, %s780_s17  ;;  %170 = vrot.lane.b32.xlu0 %v153_v4, %s780_s17  ;;  %s517_s10 = scalar_lea.sflag [#allocation5], %s900_s23  ;;  %s708_s11 = scalar_lea.vmem %s1159_s2, 1024 }
  0x42   : > { %p709_p6 = scmp.ne.s32.totalorder %s1159_s2, %s708_s11  ;;  %p1232_p11 = scmp.ne.s32.totalorder %s1215_s18, 0 }
  0x43   : > { %s783_s13 = smov [#allocation6]  }
  0x44   : > { %p710_p12 = pnand %p709_p6, %p1232_p11  ;;  %s712_s14 = sshll.u32 %s783_s13, 4  ;;  %s713_s14 = int_to_ptr.vmem [resolvable:$false] %s712_s14 }
  0x45   : > { %176 = vrot.lane.b32.xlu0 %v156_v5, %s780_s17  ;;  %178 = vrot.lane.b32.xlu1 %v157_v6, %s780_s17  ;;  %s714_s16 = scalar_lea.vmem %s713_s14, 2048  ;;  %p715_p8 = scmp.lt.s32.totalorder %s1159_s2, %s713_s14 }
  0x46   : > { %p711_p13 = pneg %p710_p12  ;;  %p716_p10 = scmp.lt.s32.totalorder %s714_s16, %s708_s11 }
  0x48   : > { %p717_p0 = por %p716_p10, %p715_p8 }
  0x49   : > { %180 = vrot.lane.b32.xlu0 %v158_v7, %s780_s17  ;;  %182 = vrot.lane.b32.xlu1 %v159_v8, %s780_s17 }
  0x4a   : > { %p718_p2 = pnand %p717_p0, %p711_p13 }
  0xaf   : > { %v173_v9 = vpop.permute.xlu1 %172  ;;  %v169_v10 = vpop.permute.xlu0 %168 }
  0xb0   : > { %195 = vst.msk [vmem:[#allocation2 + $0x19] sm:$0xff] %vm192_vm2, %v173_v9  ;;  %193 = vst.msk [vmem:[#allocation2 + $0x1] sm:$0xff] %vm192_vm2, %v169_v10 }
  0xb3   : > { %v175_v11 = vpop.permute.xlu1 %174  ;;  %v171_v12 = vpop.permute.xlu0 %170 }
  0xb4   : > { %196 = vst.msk [vmem:[#allocation2 + $0x21] sm:$0xff] %vm192_vm2, %v175_v11  ;;  %194 = vst.msk [vmem:[#allocation2 + $0x9] sm:$0xff] %vm192_vm2, %v171_v12 }
  0xb7   : > { %v177_v13 = vpop.permute.xlu0 %176  ;;  %v924_v14 = vld [vmem:[#allocation2] sm:$0xff]  ;;  %v179_v15 = vpop.permute.xlu1 %178  ;;  %v930_v16 = vld [vmem:[#allocation2 + $0x18] sm:$0xff] }
  0xb8   : > { %197 = vst.msk [vmem:[#allocation2 + $0x31] sm:$0xff] %vm192_vm2, %v177_v13  ;;  %229 = vrot.lane.b32.xlu0 %v924_v14, %s781_s25  ;;  %198 = vst.msk [vmem:[#allocation2 + $0x39] sm:$0xff] %vm192_vm2, %v179_v15  ;;  %v298_v27 = vrot.slane %v924_v14, 1  ;;  %v303_v30 = vrot.slane %v930_v16, 1  ;;  %v399_v50 = vrot.slane %v924_v14, 2  ;;  %v404_v53 = vrot.slane %v930_v16, 2 }
  0xbb   : > { %v181_v17 = vpop.permute.xlu0 %180  ;;  %v932_v18 = vld [vmem:[#allocation2 + $0x8] sm:$0xff]  ;;  %v183_v19 = vpop.permute.xlu1 %182  ;;  %v940_v20 = vld [vmem:[#allocation2 + $0x20] sm:$0xff]  ;;  %v203_v26 = vld [vmem:[#allocation2 + $0x10] sm:$0x3] }
  0xbc   : > { %199 = vst.msk [vmem:[#allocation2 + $0x49] sm:$0xff] %vm192_vm2, %v181_v17  ;;  %231 = vrot.lane.b32.xlu1 %v932_v18, %s781_s25  ;;  %233 = vrot.lane.b32.xlu0 %v930_v16, %s781_s25  ;;  %200 = vst.msk [vmem:[#allocation2 + $0x51] sm:$0xff] %vm192_vm2, %v183_v19  ;;  %v299_v25 = vrot.slane %v932_v18, 1  ;;  %v301_v29 = vrot.slane %v203_v26, 1  ;;  %v304_v31 = vrot.slane %v940_v20, 1  ;;  %v400_v49 = vrot.slane %v932_v18, 2 }
  0xbd   : > { %v206_v32 = vld [vmem:[#allocation2 + $0x28] sm:$0x3]  ;;  %v402_v52 = vrot.slane %v203_v26, 2  ;;  %v405_v54 = vrot.slane %v940_v20, 2 }
  0xbe   : > { %v977_v28 = vsel %vm297_vm3, %v298_v27, %v299_v25  ;;  %v306_v33 = vrot.slane %v206_v32, 1  ;;  %v986_v34 = vsel %vm297_vm3, %v299_v25, %v301_v29  ;;  %v989_v35 = vsel %vm297_vm3, %v303_v30, %v304_v31 }
  0xbf   : > { %v942_v21 = vld [vmem:[#allocation2 + $0x30] sm:$0xff]  ;;  %v948_v22 = vld [vmem:[#allocation2 + $0x38] sm:$0xff]  ;;  %v209_v38 = vld [vmem:[#allocation2 + $0x40] sm:$0x3]  ;;  %v1041_v51 = vsel %vm398_vm4, %v399_v50, %v400_v49  ;;  %v407_v55 = vrot.slane %v206_v32, 2  ;;  %v1050_v56 = vsel %vm398_vm4, %v400_v49, %v402_v52  ;;  %v1053_v57 = vsel %vm398_vm4, %v404_v53, %v405_v54 }
  0xc0   : > { %235 = vrot.lane.b32.xlu1 %v940_v20, %s781_s25  ;;  %237 = vrot.lane.b32.xlu0 %v942_v21, %s781_s25  ;;  %v308_v36 = vrot.slane %v942_v21, 1  ;;  %v309_v37 = vrot.slane %v948_v22, 1  ;;  %v998_v39 = vsel %vm297_vm3, %v304_v31, %v306_v33  ;;  %v311_v41 = vrot.slane %v209_v38, 1 }
  0xc1   : > { %v409_v58 = vrot.slane %v942_v21, 2  ;;  %v410_v59 = vrot.slane %v948_v22, 2  ;;  %v1062_v60 = vsel %vm398_vm4, %v405_v54, %v407_v55  ;;  %v412_v62 = vrot.slane %v209_v38, 2 }
  0xc2   : > { %v1001_v40 = vsel %vm297_vm3, %v308_v36, %v309_v37  ;;  %v1010_v45 = vsel %vm297_vm3, %v309_v37, %v311_v41  ;;  %1218 = vst [vmem:[#allocation9_spill] sm:$0xff] %v1062_v60 }
  0xc3   : > { %v950_v23 = vld [vmem:[#allocation2 + $0x48] sm:$0xff]  ;;  %v956_v24 = vld [vmem:[#allocation2 + $0x50] sm:$0xff]  ;;  %v212_v44 = vld [vmem:[#allocation2 + $0x58] sm:$0x3]  ;;  %v1065_v61 = vsel %vm398_vm4, %v409_v58, %v410_v59  ;;  %v1074_v1 = vsel %vm398_vm4, %v410_v59, %v412_v62 }
  0xc4   : > { %239 = vrot.lane.b32.xlu1 %v948_v22, %s781_s25  ;;  %241 = vrot.lane.b32.xlu0 %v950_v23, %s781_s25  ;;  %v313_v42 = vrot.slane %v950_v23, 1  ;;  %v314_v43 = vrot.slane %v956_v24, 1  ;;  %v316_v47 = vrot.slane %v212_v44, 1  ;;  %1219 = vst [vmem:[#allocation10_spill] sm:$0xff] %v1065_v61  ;;  %v414_v63 = vrot.slane %v950_v23, 2  ;;  %1220 = vst [vmem:[#allocation11_spill] sm:$0xff] %v1074_v1 }
  0xc5   : > { %v415_v0 = vrot.slane %v956_v24, 2  ;;  %v417_v3 = vrot.slane %v212_v44, 2 }
  0xc6   : > { %v1013_v46 = vsel %vm297_vm3, %v313_v42, %v314_v43  ;;  %v1020_v48 = vsel %vm297_vm3, %v314_v43, %v316_v47 }
  0xc7   : > { %v1077_v2 = vsel %vm398_vm4, %v414_v63, %v415_v0  ;;  %v1084_v4 = vsel %vm398_vm4, %v415_v0, %v417_v3 }
  0xc8   : > { %243 = vrot.lane.b32.xlu1 %v956_v24, %s781_s25  ;;  %261 = vrot.lane.b32.xlu0 %v924_v14, %s782_s27  ;;  %1221 = vst [vmem:[#allocation12_spill] sm:$0xff] %v1077_v2  ;;  %1222 = vst [vmem:[#allocation13_spill] sm:$0xff] %v1084_v4 }
  0xcc   : > { %263 = vrot.lane.b32.xlu1 %v932_v18, %s782_s27  ;;  %265 = vrot.lane.b32.xlu0 %v930_v16, %s782_s27 }
  0xd0   : > { %267 = vrot.lane.b32.xlu1 %v940_v20, %s782_s27  ;;  %269 = vrot.lane.b32.xlu0 %v942_v21, %s782_s27 }
  0xd4   : > { %271 = vrot.lane.b32.xlu1 %v948_v22, %s782_s27  ;;  %273 = vrot.lane.b32.xlu0 %v950_v23, %s782_s27 }
  0xd8   : > { %275 = vrot.lane.b32.xlu1 %v956_v24, %s782_s27  ;;  %334 = vrot.lane.b32.xlu0 %v977_v28, %s781_s25 }
  0xdc   : > { %336 = vrot.lane.b32.xlu1 %v986_v34, %s781_s25  ;;  %338 = vrot.lane.b32.xlu0 %v989_v35, %s781_s25 }
  0xe0   : > { %340 = vrot.lane.b32.xlu1 %v998_v39, %s781_s25  ;;  %342 = vrot.lane.b32.xlu0 %v1001_v40, %s781_s25 }
  0xe4   : > { %344 = vrot.lane.b32.xlu1 %v1010_v45, %s781_s25  ;;  %346 = vrot.lane.b32.xlu0 %v1013_v46, %s781_s25 }
  0xe8   : > { %348 = vrot.lane.b32.xlu1 %v1020_v48, %s781_s25  ;;  %366 = vrot.lane.b32.xlu0 %v977_v28, %s782_s27 }
  0xec   : > { %368 = vrot.lane.b32.xlu1 %v986_v34, %s782_s27  ;;  %370 = vrot.lane.b32.xlu0 %v989_v35, %s782_s27 }
  0xf0   : > { %372 = vrot.lane.b32.xlu1 %v998_v39, %s782_s27  ;;  %374 = vrot.lane.b32.xlu0 %v1001_v40, %s782_s27 }
  0xf4   : > { %376 = vrot.lane.b32.xlu1 %v1010_v45, %s782_s27  ;;  %378 = vrot.lane.b32.xlu0 %v1013_v46, %s782_s27 }
  0xf8   : > { %380 = vrot.lane.b32.xlu1 %v1020_v48, %s782_s27  ;;  %435 = vrot.lane.b32.xlu0 %v1041_v51, %s781_s25 }
  0xfc   : > { %437 = vrot.lane.b32.xlu1 %v1050_v56, %s781_s25  ;;  %439 = vrot.lane.b32.xlu0 %v1053_v57, %s781_s25 }
 0x100   : > { %441 = vrot.lane.b32.xlu1 %v1062_v60, %s781_s25  ;;  %443 = vrot.lane.b32.xlu0 %v1065_v61, %s781_s25 }
 0x104   : > { %445 = vrot.lane.b32.xlu1 %v1074_v1, %s781_s25  ;;  %447 = vrot.lane.b32.xlu0 %v1077_v2, %s781_s25 }
 0x108   : > { %449 = vrot.lane.b32.xlu1 %v1084_v4, %s781_s25  ;;  %467 = vrot.lane.b32.xlu0 %v1041_v51, %s782_s27 }
 0x10c   : > { %469 = vrot.lane.b32.xlu1 %v1050_v56, %s782_s27  ;;  %471 = vrot.lane.b32.xlu0 %v1053_v57, %s782_s27 }
 0x110   : > { %473 = vrot.lane.b32.xlu1 %v1062_v60, %s782_s27  ;;  %475 = vrot.lane.b32.xlu0 %v1065_v61, %s782_s27 }
 0x114   : > { %477 = vrot.lane.b32.xlu1 %v1074_v1, %s782_s27  ;;  %479 = vrot.lane.b32.xlu0 %v1077_v2, %s782_s27 }
 0x118   : > { %481 = vrot.lane.b32.xlu1 %v1084_v4, %s782_s27 }
 0x12a   : > { %v230_v5 = vpop.permute.xlu0 %229 }
 0x12b   : > { %v253_v53 = vadd.f32 %v230_v5, %v924_v14 }
 0x12e   : > { %v232_v6 = vpop.permute.xlu1 %231  ;;  %v234_v7 = vpop.permute.xlu0 %233 }
 0x12f   : > { %v254_v59 = vadd.f32 %v232_v6, %v932_v18  ;;  %v255_v62 = vadd.f32 %v234_v7, %v930_v16 }
 0x132   : > { %v236_v8 = vpop.permute.xlu1 %235  ;;  %v238_v9 = vpop.permute.xlu0 %237 }
 0x133   : > { %v256_v1 = vadd.f32 %v236_v8, %v940_v20 }
 0x136   : > { %v240_v10 = vpop.permute.xlu1 %239  ;;  %v242_v11 = vpop.permute.xlu0 %241 }
 0x137   : > { %v258_v6 = vadd.f32 %v240_v10, %v948_v22  ;;  %v259_v7 = vadd.f32 %v242_v11, %v950_v23 }
 0x13a   : > { %v244_v12 = vpop.permute.xlu1 %243  ;;  %v262_v13 = vpop.permute.xlu0 %261 }
 0x13b   : > { %v285_v58 = vadd.f32 %v262_v13, %v253_v53  ;;  %v1228_v53 = vld [vmem:[#allocation11_spill] sm:$0xff] }
 0x13d   : > { %v326_v2 = vadd.f32 %v977_v28, %v285_v58 }
 0x13e   : > { %v264_v15 = vpop.permute.xlu1 %263  ;;  %v266_v17 = vpop.permute.xlu0 %265 }
 0x13f   : > { %v286_v3 = vadd.f32 %v264_v15, %v254_v59  ;;  %v287_v4 = vadd.f32 %v266_v17, %v255_v62 }
 0x141   : > { %v327_v13 = vadd.f32 %v986_v34, %v286_v3  ;;  %v328_v18 = vadd.f32 %v989_v35, %v287_v4  ;;  %v260_v35 = vadd.f32 %v244_v12, %v956_v24 }
 0x142   : > { %v268_v19 = vpop.permute.xlu1 %267  ;;  %v270_v25 = vpop.permute.xlu0 %269 }
 0x143   : > { %v288_v14 = vadd.f32 %v268_v19, %v256_v1 }
 0x146   : > { %v272_v26 = vpop.permute.xlu1 %271  ;;  %v274_v27 = vpop.permute.xlu0 %273 }
 0x147   : > { %v290_v17 = vadd.f32 %v272_v26, %v258_v6  ;;  %v291_v20 = vadd.f32 %v274_v27, %v259_v7  ;;  %v1231_v7 = vld [vmem:[#allocation13_spill] sm:$0xff] }
 0x149   : > { %v331_v10 = vadd.f32 %v1010_v45, %v290_v17  ;;  %v332_v11 = vadd.f32 %v1013_v46, %v291_v20  ;;  %v1225_v46 = vld [vmem:[#allocation9_spill] sm:$0xff] }
 0x14a   : > { %v276_v29 = vpop.permute.xlu1 %275  ;;  %v335_v30 = vpop.permute.xlu0 %334 }
 0x14b   : > { %v358_v61 = vadd.f32 %v335_v30, %v326_v2  ;;  %v292_v23 = vadd.f32 %v276_v29, %v260_v35 }
 0x14d   : > { %v333_v45 = vadd.f32 %v1020_v48, %v292_v23 }
 0x14e   : > { %v337_v31 = vpop.permute.xlu1 %336  ;;  %v339_v32 = vpop.permute.xlu0 %338 }
 0x14f   : > { %v359_v15 = vadd.f32 %v337_v31, %v327_v13  ;;  %v360_v28 = vadd.f32 %v339_v32, %v328_v18 }
 0x152   : > { %v341_v33 = vpop.permute.xlu1 %340  ;;  %v343_v36 = vpop.permute.xlu0 %342 }
 0x156   : > { %v345_v37 = vpop.permute.xlu1 %344  ;;  %v347_v38 = vpop.permute.xlu0 %346 }
 0x157   : > { %v363_v30 = vadd.f32 %v345_v37, %v331_v10  ;;  %v364_v24 = vadd.f32 %v347_v38, %v332_v11 }
 0x15a   : > { %v1104_v41 = vpop.permute.xlu1 %348  ;;  %v367_v42 = vpop.permute.xlu0 %366 }
 0x15b   : > { %1223 = vst [vmem:[#allocation14_spill] sm:$0xff] %v1104_v41  ;;  %v257_v41 = vadd.f32 %v238_v9, %v942_v21  ;;  %v390_v16 = vadd.f32 %v367_v42, %v358_v61  ;;  %v329_v21 = vadd.f32 %v998_v39, %v288_v14 }
 0x15d   : > { %v289_v60 = vadd.f32 %v270_v25, %v257_v41  ;;  %v427_v34 = vadd.f32 %v1041_v51, %v390_v16  ;;  %v361_v61 = vadd.f32 %v341_v33, %v329_v21 }
 0x15e   : > { %v369_v43 = vpop.permute.xlu1 %368  ;;  %v371_v44 = vpop.permute.xlu0 %370 }
 0x15f   : > { %v330_v8 = vadd.f32 %v1001_v40, %v289_v60  ;;  %v391_v9 = vadd.f32 %v369_v43, %v359_v15  ;;  %v392_v19 = vadd.f32 %v371_v44, %v360_v28  ;;  %v1226_v43 = vld [vmem:[#allocation10_spill] sm:$0xff] }
 0x161   : > { %v362_v22 = vadd.f32 %v343_v36, %v330_v8  ;;  %v428_v40 = vadd.f32 %v1050_v56, %v391_v9  ;;  %v429_v60 = vadd.f32 %v1053_v57, %v392_v19 }
 0x162   : > { %v373_v47 = vpop.permute.xlu1 %372  ;;  %v375_v49 = vpop.permute.xlu0 %374  ;;  %v1227_v38 = vld [vmem:[#allocation14_spill] sm:$0xff] }
 0x163   : > { %v393_v25 = vadd.f32 %v373_v47, %v361_v61  ;;  %v394_v27 = vadd.f32 %v375_v49, %v362_v22  ;;  %v365_v48 = vadd.f32 %v1227_v38, %v333_v45 }
 0x165   : > { %v430_v33 = vadd.f32 %v1225_v46, %v393_v25  ;;  %v431_v56 = vadd.f32 %v1226_v43, %v394_v27 }
 0x166   : > { %v377_v50 = vpop.permute.xlu1 %376  ;;  %v379_v52 = vpop.permute.xlu0 %378 }
 0x167   : > { %v395_v32 = vadd.f32 %v377_v50, %v363_v30  ;;  %v396_v42 = vadd.f32 %v379_v52, %v364_v24 }
 0x169   : > { %v432_v52 = vadd.f32 %v1228_v53, %v395_v32 }
 0x16a   : > { %v1107_v54 = vpop.permute.xlu1 %380  ;;  %v436_v55 = vpop.permute.xlu0 %435 }
 0x16b   : > { %1224 = vst [vmem:[#allocation15_spill] sm:$0xff] %v1107_v54  ;;  %v459_v4 = vadd.f32 %v436_v55, %v427_v34 }
 0x16e   : > { %v438_v63 = vpop.permute.xlu1 %437  ;;  %v440_v0 = vpop.permute.xlu0 %439 }
 0x16f   : > { %v460_v12 = vadd.f32 %v438_v63, %v428_v40  ;;  %v461_v31 = vadd.f32 %v440_v0, %v429_v60  ;;  %v1230_v63 = vld [vmem:[#allocation12_spill] sm:$0xff] }
 0x170   : > { %v433_v0 = vadd.f32 %v1230_v63, %v396_v42 }
 0x172   : > { %v442_v5 = vpop.permute.xlu1 %441  ;;  %v444_v54 = vpop.permute.xlu0 %443  ;;  %v1229_v59 = vld [vmem:[#allocation15_spill] sm:$0xff] }
 0x173   : > { %v462_v44 = vadd.f32 %v442_v5, %v430_v33  ;;  %v463_v47 = vadd.f32 %v444_v54, %v431_v56  ;;  %v397_v62 = vadd.f32 %v1229_v59, %v365_v48 }
 0x175   : > { %v434_v15 = vadd.f32 %v1231_v7, %v397_v62 }
 0x176   : > { %v446_v2 = vpop.permute.xlu1 %445  ;;  %v448_v1 = vpop.permute.xlu0 %447 }
 0x177   : > { %v464_v54 = vadd.f32 %v446_v2, %v432_v52  ;;  %v465_v5 = vadd.f32 %v448_v1, %v433_v0 }
 0x17a   : > { %v450_v39 = vpop.permute.xlu1 %449  ;;  %v468_v26 = vpop.permute.xlu0 %467 }
 0x17b   : > { %v491_v51 = vadd.f32 %v468_v26, %v459_v4  ;;  %v466_v20 = vadd.f32 %v450_v39, %v434_v15 }
 0x17d   : > { %v499_v29 = vmul.f32 0.11111111, %v491_v51 }
 0x17e   : > { %v470_v36 = vpop.permute.xlu1 %469  ;;  %v472_v41 = vpop.permute.xlu0 %471 }
 0x17f   : > { %508 = vst.msk [vmem:[%s1131_s28] sm:$0xff] %vm507_vm5, %v499_v29  ;;  %v492_v57 = vadd.f32 %v470_v36, %v460_v12  ;;  %v493_v37 = vadd.f32 %v472_v41, %v461_v31 }
 0x181   : > { %v500_v49 = vmul.f32 0.11111111, %v492_v57  ;;  %v501_v50 = vmul.f32 0.11111111, %v493_v37 }
 0x182   : > { %v474_v55 = vpop.permute.xlu1 %473  ;;  %v476_v58 = vpop.permute.xlu0 %475 }
 0x183   : > { %509 = vst.msk [vmem:[%s1131_s28 + $0x8] sm:$0xff] %vm507_vm5, %v500_v49  ;;  %510 = vst.msk [vmem:[%s1131_s28 + $0x10] sm:$0xff] %vm507_vm5, %v501_v50  ;;  %v494_v3 = vadd.f32 %v474_v55, %v462_v44  ;;  %v495_v14 = vadd.f32 %v476_v58, %v463_v47 }
 0x185   : > { %v502_v13 = vmul.f32 0.11111111, %v494_v3  ;;  %v503_v18 = vmul.f32 0.11111111, %v495_v14 }
 0x186   : > { %v478_v16 = vpop.permute.xlu1 %477  ;;  %v480_v6 = vpop.permute.xlu0 %479 }
 0x187   : > { %511 = vst.msk [vmem:[%s1131_s28 + $0x18] sm:$0xff] %vm507_vm5, %v502_v13  ;;  %512 = vst.msk [vmem:[%s1131_s28 + $0x20] sm:$0xff] %vm507_vm5, %v503_v18  ;;  %v496_v28 = vadd.f32 %v478_v16, %v464_v54  ;;  %v497_v17 = vadd.f32 %v480_v6, %v465_v5 }
 0x189   : > { %v504_v21 = vmul.f32 0.11111111, %v496_v28  ;;  %v505_v2 = vmul.f32 0.11111111, %v497_v17 }
 0x18a   : > { %v482_v1 = vpop.permute.xlu1 %481 }
 0x18b   : > { %513 = vst.msk [vmem:[%s1131_s28 + $0x28] sm:$0xff] %vm507_vm5, %v504_v21  ;;  %514 = vst.msk [vmem:[%s1131_s28 + $0x30] sm:$0xff] %vm507_vm5, %v505_v2  ;;  %v498_v8 = vadd.f32 %v482_v1, %v466_v20 }
 0x18d   : > { %v506_v9 = vmul.f32 0.11111111, %v498_v8 }
 0x18f   : > { %515 = vst.msk [vmem:[%s1131_s28 + $0x38] sm:$0xff] %vm507_vm5, %v506_v9 }
 0x190   : > { %721 = shalt.err (!%p718_p2)
}
 0x191   : > { %s722_s20 = scalar_lea.hbm %s1157_s5, 1024  ;;  %s726_s24 = scalar_lea.hbm %s1206_s1, 2048 }
 0x192   : > { %p723_p4 = scmp.ne.s32.totalorder %s1157_s5, %s722_s20  ;;  %p727_p9 = scmp.lt.u32.totalorder %s1157_s5, %s1206_s1 }
 0x193   : > { %p728_p1 = scmp.lt.u32.totalorder %s726_s24, %s722_s20  ;;  %p730_p6 = scmp.lt.u32.totalorder %s722_s20, %s1157_s5 }
 0x194   : > { %p724_p5 = pnand %p723_p4, %p1232_p11 }
 0x195   : > { %p729_p3 = por %p728_p1, %p727_p9 }
 0x196   : > { %p725_p7 = pneg %p724_p5 }
 0x197   : > { %p731_p12 = por %p730_p6, %p729_p3 }
 0x199   : > { %p732_p13 = pnand %p731_p12, %p725_p7 }
 0x19b   : > { %735 = shalt.err (!%p732_p13)
}
 0x19c   : > { %s784_s17 = smov 128   ;;  %s785_s25 = smov 8  }
 0x19d   : > { %626 = dma.vmem_to_hbm [thread:$0]  (%p1232_p11), %s1159_s2, 1024, %s1157_s5, %s517_s10, %s784_s17, %s784_s17, %s785_s25  }
 0x19e PF: > { %s546_s27 = sand.u32 1, %s762_s6   ;;  %p1233_p8 = scmp.ne.s32.totalorder %s1216_s19, 0 }
 0x19f   : > { %p1234_p10 = scmp.ge.s32.totalorder %s774_s9, 2  ;;  %s547_s28 = scalar_lea.sflag [#allocation5], %s546_s27 }
 0x1a1   : > { %p633_p0 = pnand %p1234_p10, %p1233_p8 }
 0x1a3   : > { %757 = dma.done.wait (!%p633_p0), %s547_s28, 1024  }
 0x1a4   : > { %759 = vsyncadd (!%p633_p0), %s547_s28, 4294966272  ;;  %p14_p2 = scmp.ge.s32.totalorder %s821_s12, 4   ;;  %s1235_s6 = smov %s766_s7 }
 0x1a5   : > { %s1236_s7 = smov %s770_s8  ;;  %s1237_s8 = smov %s833_s15 }
 0x1a6   : > { %s1238_s9 = smov %s821_s12  ;;  %16 = sbr.rel (!%p14_p2) target bundleno = 5 (0x5), region = 69 }
 0x1ad   :  { %552 = vsyncpa [#allocation4], 1 }
 0x1ae   :  { %554 = vsyncpa [#allocation4 + $0x1], 1 }
 0x1af   :  { %555 = vsyncpa [#allocation5], 1 }
 0x1b0   :  { %557 = vsyncpa [#allocation5 + $0x1], 1 }

</bundles_post_ra>
